<compile_context>
chip_gen: v7x
topology: tpu7x:2x2x1
jax: 0.10.0
libtpu: 0.0.40
codegen_flags: <defaults>
</compile_context>

<pallas_src>
import jax
import jax.numpy as jnp
from jax.experimental import pallas as pl
from jax.experimental.pallas import tpu as pltpu

HIDDEN = 50
H_PAD = 56      # hidden units padded to a multiple of 8 sublanes (7 vregs/group)
LANE = 128      # lane width


# ---------------------------------------------------------------------------
# Pallas kernel: h = relu(w1 * x + b1)      (VPU broadcast over lanes)
#                y = sum_sublanes(w2 * h)   (XLU sublane reduction) + b2 (SMEM)
# ---------------------------------------------------------------------------
def odefunc_kernel(x_ref, w1_ref, b1_ref, w2_ref, b2_ref, o_ref):
    x = x_ref[...]                                   # (1, TB)      batch on lanes
    w1 = w1_ref[...]                                 # (H_PAD, 1)
    b1 = b1_ref[...]                                 # (H_PAD, 1)
    w2 = w2_ref[...]                                 # (H_PAD, 1)
    b2 = b2_ref[0]                                   # scalar, read from SMEM

    h = jnp.maximum(w1 * x + b1, 0.0)                # (H_PAD, TB)  VPU
    y = jnp.sum(w2 * h, axis=0, keepdims=True)       # (1, TB)      XLU sublane reduce
    o_ref[...] = y + b2                              # lane-dense store


# ---------------------------------------------------------------------------
# One-time prepare: pad params once, return a jitted forward(t, x) closure.
# ---------------------------------------------------------------------------
def make_odefunc(params, *, tile_b=2048):
    assert tile_b % LANE == 0, "tile_b must be a multiple of 128 lanes"
    w1, b1, w2, b2 = params  # torch shapes: (50, 1), (50,), (1, 50), (1,)

    # Hoisted, exact zero-padding of the parameters (done once, not per call).
    w1_col = jnp.zeros((H_PAD, 1), jnp.float32).at[:HIDDEN, 0].set(
        w1[:, 0].astype(jnp.float32))
    b1_col = jnp.zeros((H_PAD, 1), jnp.float32).at[:HIDDEN, 0].set(
        b1.astype(jnp.float32))
    w2_col = jnp.zeros((H_PAD, 1), jnp.float32).at[:HIDDEN, 0].set(
        w2[0, :].astype(jnp.float32))
    b2_s = jnp.reshape(b2.astype(jnp.float32), (1,))  # scalar -> SMEM

    @jax.jit
    def forward(t, x):
        """Equivalent of ODEFunc.forward(t, x); x: (B, 1) float32 -> (B, 1)."""
        del t  # t is unused in the reference forward pass
        B = x.shape[0]

        # (B, 1) -> (1, B): identical row-major linearization => free reshape,
        # no zero-fill / dynamic_update_slice and no extra HBM round trip.
        x_row = x.reshape(1, B).astype(jnp.float32)

        # Adaptive tiling: one full-array block for small/medium B (block dims
        # equal to the full array satisfy the (8,128) rule with no masking);
        # 128-multiple tiles for large B (partial last block is masked by
        # Pallas, garbage OOB lanes are per-lane and never stored).
        tb = B if B <= tile_b else tile_b
        n_tiles = pl.cdiv(B, tb)

        out_row = pl.pallas_call(
            odefunc_kernel,
            out_shape=jax.ShapeDtypeStruct((1, B), jnp.float32),
            grid=(n_tiles,),
            in_specs=[
                pl.BlockSpec((1, tb), lambda i: (0, i)),       # x tile (batch)
                pl.BlockSpec((H_PAD, 1), lambda i: (0, 0)),    # w1 (resident)
                pl.BlockSpec((H_PAD, 1), lambda i: (0, 0)),    # b1 (resident)
                pl.BlockSpec((H_PAD, 1), lambda i: (0, 0)),    # w2 (resident)
                pl.BlockSpec(memory_space=pltpu.MemorySpace.SMEM),  # b2 scalar
            ],
            out_specs=pl.BlockSpec((1, tb), lambda i: (0, i)),
            compiler_params=pltpu.CompilerParams(
                dimension_semantics=("parallel",)),            # megacore split
        )(x_row, w1_col, b1_col, w2_col, b2_s)

        # (1, B) -> (B, 1) is a free reshape (same linear order), fused in-jit.
        return out_row.reshape(B, 1)

    return forward


# ---------------------------------------------------------------------------
# Deterministic parameter init (PyTorch nn.Linear default: U(-1/sqrt(fan_in), .))
# ---------------------------------------------------------------------------
def init_params(key):
    k1, k2, k3, k4 = jax.random.split(key, 4)
    bound1 = 1.0 / jnp.sqrt(1.0)     # fc1 fan_in = 1
    bound2 = 1.0 / jnp.sqrt(50.0)    # fc2 fan_in = 50
    w1 = jax.random.uniform(k1, (50, 1), jnp.float32, -bound1, bound1)
    b1 = jax.random.uniform(k2, (50,), jnp.float32, -bound1, bound1)
    w2 = jax.random.uniform(k3, (1, 50), jnp.float32, -bound2, bound2)
    b2 = jax.random.uniform(k4, (1,), jnp.float32, -bound2, bound2)
    return (w1, b1, w2, b2)


def reference_forward(t, x, params):
    """Plain-JAX reference mirroring the PyTorch module."""
    del t
    w1, b1, w2, b2 = params
    h = jnp.maximum(x @ w1.T + b1, 0.0)
    return h @ w2.T + b2


if __name__ == "__main__":
    key = jax.random.PRNGKey(0)
    pkey, xkey, xkey2 = jax.random.split(key, 3)
    params = init_params(pkey)
    t = jnp.float32(0.0)

    # Small case: single full-array block, grid=(1,), no padding anywhere.
    ode_f = make_odefunc(params)
    B = 8
    x = jax.random.normal(xkey, (B, 1), jnp.float32)
    y = jax.block_until_ready(ode_f(t, x))
    y_ref = reference_forward(t, x, params)
    assert y.shape == (B, 1)
    assert jnp.allclose(y, y_ref, atol=1e-5, rtol=1e-5)

    # Multi-tile case: exercises batch tiling over the (parallel) grid axis,
    # including a masked partial last block (300 = 2*128 + 44 lanes).
    ode_f_tiled = make_odefunc(params, tile_b=128)
    B2 = 300
    x2 = jax.random.normal(xkey2, (B2, 1), jnp.float32)
    y2 = jax.block_until_ready(ode_f_tiled(t, x2))
    y2_ref = reference_forward(t, x2, params)
    assert y2.shape == (B2, 1)
    assert jnp.allclose(y2, y2_ref, atol=1e-5, rtol=1e-5)

    print("KERNEL_OK")
</pallas_src>

<mosaic_0001>
module attributes {stable_mosaic.version = 11 : i64} {
  func.func @odefunc_kernel(%arg0: i32, %arg1: memref<1x8xf32, #tpu.memory_space<vmem>>, %arg2: memref<56x1xf32, #tpu.memory_space<vmem>>, %arg3: memref<56x1xf32, #tpu.memory_space<vmem>>, %arg4: memref<56x1xf32, #tpu.memory_space<vmem>>, %arg5: memref<1xf32, #tpu.memory_space<smem>>, %arg6: memref<1x8xf32, #tpu.memory_space<vmem>>) attributes {dimension_semantics = [#tpu.dimension_semantics<parallel>], iteration_bounds = array<i64: 1>, scalar_prefetch = 0 : i64, scratch_operands = 0 : i64, tpu.core_type = #tpu.core_type<tc>, window_params = [{transform_indices = @transform_0, window_bounds = array<i64: 1, 8>}, {pipeline_mode = #tpu.pipeline_mode<synchronous>, transform_indices = @transform_1, window_bounds = array<i64: 56, 1>}, {pipeline_mode = #tpu.pipeline_mode<synchronous>, transform_indices = @transform_2, window_bounds = array<i64: 56, 1>}, {pipeline_mode = #tpu.pipeline_mode<synchronous>, transform_indices = @transform_3, window_bounds = array<i64: 56, 1>}, {transform_indices = @transform_4, window_bounds = array<i64: 1>}, {transform_indices = @transform_5, window_bounds = array<i64: 1, 8>}]} {
    %c0 = arith.constant 0 : index
    %c0_0 = arith.constant 0 : index
    %0 = vector.load %arg1[%c0, %c0_0] : memref<1x8xf32, #tpu.memory_space<vmem>>, vector<1x8xf32>
    %c0_1 = arith.constant 0 : index
    %c0_2 = arith.constant 0 : index
    %1 = vector.load %arg2[%c0_1, %c0_2] : memref<56x1xf32, #tpu.memory_space<vmem>>, vector<56x1xf32>
    %c0_3 = arith.constant 0 : index
    %c0_4 = arith.constant 0 : index
    %2 = vector.load %arg3[%c0_3, %c0_4] : memref<56x1xf32, #tpu.memory_space<vmem>>, vector<56x1xf32>
    %c0_5 = arith.constant 0 : index
    %c0_6 = arith.constant 0 : index
    %3 = vector.load %arg4[%c0_5, %c0_6] : memref<56x1xf32, #tpu.memory_space<vmem>>, vector<56x1xf32>
    %c0_7 = arith.constant 0 : index
    %4 = memref.load %arg5[%c0_7] : memref<1xf32, #tpu.memory_space<smem>>
    %5 = vector.broadcast %1 : vector<56x1xf32> to vector<56x8xf32>
    %6 = vector.broadcast %0 : vector<1x8xf32> to vector<56x8xf32>
    %7 = arith.mulf %5, %6 : vector<56x8xf32>
    %8 = vector.broadcast %2 : vector<56x1xf32> to vector<56x8xf32>
    %9 = arith.addf %7, %8 : vector<56x8xf32>
    %cst = arith.constant 0.000000e+00 : f32
    %10 = vector.broadcast %cst : f32 to vector<56x8xf32>
    %11 = arith.maximumf %9, %10 : vector<56x8xf32>
    %12 = vector.broadcast %3 : vector<56x1xf32> to vector<56x8xf32>
    %13 = arith.mulf %12, %11 : vector<56x8xf32>
    %cst_8 = arith.constant dense<0.000000e+00> : vector<8xf32>
    %14 = vector.multi_reduction <add>, %13, %cst_8 [0] : vector<56x8xf32> to vector<8xf32>
    %15 = vector.shape_cast %14 : vector<8xf32> to vector<1x8xf32>
    %16 = vector.broadcast %4 : f32 to vector<1x8xf32>
    %17 = arith.addf %15, %16 : vector<1x8xf32>
    %c0_9 = arith.constant 0 : index
    %c0_10 = arith.constant 0 : index
    %18 = vector.load %arg6[%c0_9, %c0_10] : memref<1x8xf32, #tpu.memory_space<vmem>>, vector<1x8xf32>
    tpu.vector_store %arg6[%c0_9, %c0_10], %17 {strides = array<i32>} : memref<1x8xf32, #tpu.memory_space<vmem>>, vector<1x8xf32>,
    return
  }
  func.func @transform_0(%arg0: i32) -> (i32, i32) {
    %c0_i32 = arith.constant 0 : i32
    %c0_i32_0 = arith.constant 0 : i32
    return %c0_i32, %arg0 : i32, i32
  }
  func.func @transform_1(%arg0: i32) -> (i32, i32) {
    %c0_i32 = arith.constant 0 : i32
    %c0_i32_0 = arith.constant 0 : i32
    %c0_i32_1 = arith.constant 0 : i32
    return %c0_i32, %c0_i32_0 : i32, i32
  }
  func.func @transform_2(%arg0: i32) -> (i32, i32) {
    %c0_i32 = arith.constant 0 : i32
    %c0_i32_0 = arith.constant 0 : i32
    %c0_i32_1 = arith.constant 0 : i32
    return %c0_i32, %c0_i32_0 : i32, i32
  }
  func.func @transform_3(%arg0: i32) -> (i32, i32) {
    %c0_i32 = arith.constant 0 : i32
    %c0_i32_0 = arith.constant 0 : i32
    %c0_i32_1 = arith.constant 0 : i32
    return %c0_i32, %c0_i32_0 : i32, i32
  }
  func.func @transform_4(%arg0: i32) -> i32 {
    %c0_i32 = arith.constant 0 : i32
    %c0_i32_0 = arith.constant 0 : i32
    return %c0_i32 : i32
  }
  func.func @transform_5(%arg0: i32) -> (i32, i32) {
    %c0_i32 = arith.constant 0 : i32
    %c0_i32_0 = arith.constant 0 : i32
    return %c0_i32, %arg0 : i32, i32
  }
}

</mosaic_0001>

<bundles_post_ra>
// kernel: forward.1
= control target key start
LH: loop header
LB: loop body
LE: loop exit
PB: predicated region body
PF: predicated region fallthrough
CT: control target
= control target key end

     0   :  { %11 = vsyncpa [#allocation4], 0  ;;  %s483_s0 = inlined_call_operand.vmem [shape: f32[1,8], index: 0, kind: input, shape index: {}]   ;;  %s484_s1 = inlined_call_operand.hbm [shape: f32[56,1], index: 1, kind: input, shape index: {}]   ;;  %s485_s2 = inlined_call_operand.hbm [shape: f32[56,1], index: 2, kind: input, shape index: {}]   ;;  %s486_s3 = inlined_call_operand.hbm [shape: f32[56,1], index: 3, kind: input, shape index: {}]   ;;  %s487_s4 = inlined_call_operand.<no memory space> [shape: f32[1], index: 4, kind: input, shape index: {}]   ;;  %s488_s5 = inlined_call_operand.hbm [shape: f32[1,8], index: 5, kind: output, shape index: {}]  }
   0x1   :  { %12 = vsyncpa [#allocation7], 0 }
   0x2   :  { %13 = vsyncpa [#allocation5], 0  ;;  %s369_s18 = smov [#allocation6]   ;;  %s370_s20 = smov [#allocation3]  }
   0x3   :  { %s33_s19 = sshll.u32 %s369_s18, 4  ;;  %s21_s21 = sshll.u32 %s370_s20, 4  ;;  %s34_s19 = int_to_ptr.vmem [resolvable:$true] %s33_s19  ;;  %s406_s21 = int_to_ptr.vmem [resolvable:$true] %s21_s21 }
   0x4   :  { %s275_s24 = scalar_lea.hbm %s485_s2, 896 }
   0x5   :  { %p276_p0 = scmp.ne.s32.totalorder %s485_s2, %s275_s24  ;;  %p279_p1 = scmp.lt.u32.totalorder %s275_s24, %s485_s2 }
   0x7   :  { %p281_p2 = pnand %p279_p1, %p276_p0 }
   0x9   :  { %284 = shalt.err (!%p281_p2)
}
   0xa   :  { %s285_s29 = scalar_lea.vmem %s34_s19, 896  ;;  %p290_p4 = scmp.lt.s32.totalorder %s34_s19, %s34_s19 }
   0xb   :  { %p286_p3 = scmp.ne.s32.totalorder %s34_s19, %s285_s29  ;;  %p291_p5 = scmp.lt.s32.totalorder %s285_s29, %s285_s29 }
   0xd   :  { %p292_p6 = por %p291_p5, %p290_p4 }
   0xf   :  { %p293_p7 = pnand %p292_p6, %p286_p3 }
  0x11   :  { %296 = shalt.err (!%p293_p7)
}
  0x12   :  { %s371_s30 = smov 128   ;;  %s372_s6 = smov 8  }
  0x13   :  { %39 = dma.hbm_to_vmem [thread:$0]  %s485_s2, 896, %s34_s19, [#allocation7], %s371_s30, %s371_s30, %s372_s6  }
  0x14   :  { %s297_s11 = scalar_lea.hbm %s484_s1, 896 }
  0x15   :  { %p298_p8 = scmp.ne.s32.totalorder %s484_s1, %s297_s11  ;;  %p301_p9 = scmp.lt.u32.totalorder %s297_s11, %s484_s1 }
  0x17   :  { %p303_p10 = pnand %p301_p9, %p298_p8 }
  0x19   :  { %306 = shalt.err (!%p303_p10)
}
  0x1a   :  { %s307_s16 = scalar_lea.vmem %s406_s21, 896  ;;  %p312_p12 = scmp.lt.s32.totalorder %s406_s21, %s406_s21 }
  0x1b   :  { %p308_p11 = scmp.ne.s32.totalorder %s406_s21, %s307_s16  ;;  %p313_p13 = scmp.lt.s32.totalorder %s307_s16, %s307_s16 }
  0x1d   :  { %p314_p0 = por %p313_p13, %p312_p12 }
  0x1f   :  { %p315_p1 = pnand %p314_p0, %p308_p11 }
  0x21   :  { %318 = shalt.err (!%p315_p1)
}
  0x22   :  { %27 = dma.hbm_to_vmem [thread:$0]  %s484_s1, 896, %s406_s21, [#allocation4], %s371_s30, %s371_s30, %s372_s6  }
  0x23   :  { %s373_s18 = smov [#allocation8]   ;;  %s319_s23 = scalar_lea.hbm %s486_s3, 896 }
  0x24   :  { %s45_s19 = sshll.u32 %s373_s18, 4  ;;  %p320_p2 = scmp.ne.s32.totalorder %s486_s3, %s319_s23  ;;  %s46_s19 = int_to_ptr.vmem [resolvable:$true] %s45_s19 }
  0x25   :  { %p323_p3 = scmp.lt.u32.totalorder %s319_s23, %s486_s3 }
  0x27   :  { %p325_p4 = pnand %p323_p3, %p320_p2 }
  0x29   :  { %328 = shalt.err (!%p325_p4)
}
  0x2a   :  { %s329_s28 = scalar_lea.vmem %s46_s19, 896  ;;  %p334_p6 = scmp.lt.s32.totalorder %s46_s19, %s46_s19 }
  0x2b   :  { %p330_p5 = scmp.ne.s32.totalorder %s46_s19, %s329_s28  ;;  %p335_p7 = scmp.lt.s32.totalorder %s329_s28, %s329_s28 }
  0x2d   :  { %p336_p8 = por %p335_p7, %p334_p6 }
  0x2f   :  { %p337_p9 = pnand %p336_p8, %p330_p5 }
  0x31   :  { %340 = shalt.err (!%p337_p9)
}
  0x32   :  { %51 = dma.hbm_to_vmem [thread:$0]  %s486_s3, 896, %s46_s19, [#allocation7], %s371_s30, %s371_s30, %s372_s6  }
  0x33   :  { %363 = dma.done.wait [#allocation4], 896  }
  0x34   :  { %364 = vsyncadd [#allocation4], 4294966400 }
  0x35   :  { %365 = dma.done.wait [#allocation7], 1792  }
  0x36   :  { %366 = vsyncadd [#allocation7], 4294965504  ;;  %v374_v0 = vmov 0   ;;  %v66_v1 = vld [vmem:[#allocation3 + $0x10] sm:$0xff]  ;;  %v64_v2 = vld [vmem:[#allocation3] sm:$0xff]  ;;  %vm225_vm0 = vcmask 64512  }
  0x37   :  { %274 = vset.pattern.permute.xlu1 %v374_v0  ;;  %273 = vset.pattern.permute.xlu0 %v374_v0  ;;  %v71_v3 = vld [vmem:[#allocation6] sm:$0xff]  ;;  %v65_v4 = vld [vmem:[#allocation3 + $0x8] sm:$0xff]  ;;  %v72_v6 = vld [vmem:[#allocation6 + $0x8] sm:$0xff]  ;;  %s375_s6 = smov [#allocation9]   ;;  %vm247_vm1 = vcmask 57344  }
  0x38   :  { %98 = vperm.xlu1 %274, %v66_v1   ;;  %88 = vperm.xlu0 %273, %v64_v2   ;;  %v67_v5 = vld [vmem:[#allocation3 + $0x18] sm:$0xff]  ;;  %v68_v7 = vld [vmem:[#allocation3 + $0x20] sm:$0xff]  ;;  %v73_v8 = vld [vmem:[#allocation6 + $0x10] sm:$0xff]  ;;  %s255_s7 = sshll.u32 %s375_s6, 4  ;;  %s256_s7 = int_to_ptr.vmem [resolvable:$true] %s255_s7 }
  0x39   :  { %v78_v9 = vld [vmem:[#allocation8] sm:$0xff]  ;;  %v69_v11 = vld [vmem:[#allocation3 + $0x28] sm:$0xff]  ;;  %v79_v12 = vld [vmem:[#allocation8 + $0x8] sm:$0xff]  ;;  %s341_s8 = scalar_lea.vmem %s256_s7, 16  ;;  %s345_s9 = scalar_lea.vmem %s256_s7, 32 }
  0x3a   :  { %v74_v10 = vld [vmem:[#allocation6 + $0x18] sm:$0xff]  ;;  %v80_v13 = vld [vmem:[#allocation8 + $0x10] sm:$0xff]  ;;  %v75_v14 = vld [vmem:[#allocation6 + $0x20] sm:$0xff]  ;;  %p342_p10 = scmp.ne.s32.totalorder %s256_s7, %s341_s8  ;;  %p346_p11 = scmp.lt.s32.totalorder %s256_s7, %s256_s7 }
  0x3b   :  { %v76_v15 = vld [vmem:[#allocation6 + $0x28] sm:$0xff]  ;;  %v70_v16 = vld [vmem:[#allocation3 + $0x30] sm:$0xff]  ;;  %v77_v17 = vld [vmem:[#allocation6 + $0x30] sm:$0xff]  ;;  %p347_p12 = scmp.lt.s32.totalorder %s345_s9, %s341_s8 }
  0x3c   :  { %136 = vperm.xlu1 %274, %v71_v3   ;;  %93 = vperm.xlu0 %273, %v65_v4   ;;  %v81_v18 = vld [vmem:[#allocation8 + $0x18] sm:$0xff]  ;;  %v83_v19 = vld [vmem:[#allocation8 + $0x28] sm:$0xff]  ;;  %v82_v20 = vld [vmem:[#allocation8 + $0x20] sm:$0xff] }
  0x3d   :  { %v84_v21 = vld [vmem:[#allocation8 + $0x30] sm:$0xff]  ;;  %p348_p13 = por %p347_p12, %p346_p11 }
  0x3e   :  { %v265_v32 = vld [vmem:[%s483_s0] ss:$0 sm:$0xff] }
  0x3f   :  { %p349_p0 = pnand %p348_p13, %p342_p10 }
  0x40   :  { %103 = vperm.xlu1 %274, %v67_v5   ;;  %141 = vperm.xlu0 %273, %v72_v6  }
  0x44   :  { %108 = vperm.xlu1 %274, %v68_v7   ;;  %146 = vperm.xlu0 %273, %v73_v8  }
  0x48   :  { %185 = vperm.xlu1 %274, %v78_v9   ;;  %151 = vperm.xlu0 %273, %v74_v10  }
  0x4c   :  { %113 = vperm.xlu1 %274, %v69_v11   ;;  %190 = vperm.xlu0 %273, %v79_v12  }
  0x50   :  { %195 = vperm.xlu1 %274, %v80_v13   ;;  %156 = vperm.xlu0 %273, %v75_v14  }
  0x54   :  { %161 = vperm.xlu1 %274, %v76_v15   ;;  %118 = vperm.xlu0 %273, %v70_v16  }
  0x58   :  { %166 = vperm.xlu1 %274, %v77_v17   ;;  %200 = vperm.xlu0 %273, %v81_v18  }
  0x5c   :  { %210 = vperm.xlu1 %274, %v83_v19   ;;  %205 = vperm.xlu0 %273, %v82_v20  }
  0x60   :  { %215 = vperm.xlu0 %273, %v84_v21  }
  0xb7   :  { %v99_v22 = vpop.permute.xlu1 %98  ;;  %v89_v23 = vpop.permute.xlu0 %88 }
  0xb8   :  { %v129_v36 = vmul.f32 %v265_v32, %v99_v22  ;;  %v127_v37 = vmul.f32 %v265_v32, %v89_v23 }
  0xbb   :  { %v137_v24 = vpop.permute.xlu1 %136  ;;  %v94_v25 = vpop.permute.xlu0 %93 }
  0xbc   :  { %v128_v33 = vmul.f32 %v265_v32, %v94_v25  ;;  %v169_v39 = vadd.f32 %v137_v24, %v127_v37 }
  0xbe   :  { %v176_v45 = vmax.f32 %v169_v39, 0.0 }
  0xbf   :  { %v104_v26 = vpop.permute.xlu1 %103  ;;  %v142_v27 = vpop.permute.xlu0 %141 }
  0xc0   :  { %v170_v38 = vadd.f32 %v142_v27, %v128_v33  ;;  %v130_v43 = vmul.f32 %v265_v32, %v104_v26  ;;  %v245_v26 = vstv %s487_s4 }
  0xc2   :  { %v177_v44 = vmax.f32 %v170_v38, 0.0 }
  0xc3   :  { %v109_v28 = vpop.permute.xlu1 %108  ;;  %v147_v29 = vpop.permute.xlu0 %146 }
  0xc4   :  { %v171_v40 = vadd.f32 %v147_v29, %v129_v36  ;;  %v131_v51 = vmul.f32 %v265_v32, %v109_v28 }
  0xc6   :  { %v178_v46 = vmax.f32 %v171_v40, 0.0 }
  0xc7   :  { %v186_v30 = vpop.permute.xlu1 %185  ;;  %v152_v31 = vpop.permute.xlu0 %151 }
  0xc8   :  { %v172_v47 = vadd.f32 %v152_v31, %v130_v43  ;;  %v218_v52 = vmul.f32 %v186_v30, %v176_v45 }
  0xca   :  { %v179_v55 = vmax.f32 %v172_v47, 0.0  ;;  %v226_v61 = vsel %vm225_vm0, %v218_v52, 0.0 }
  0xcb   :  { %v114_v34 = vpop.permute.xlu1 %113  ;;  %v191_v35 = vpop.permute.xlu0 %190 }
  0xcc   :  { %v219_v48 = vmul.f32 %v191_v35, %v177_v44  ;;  %v132_v53 = vmul.f32 %v265_v32, %v114_v34 }
  0xce   :  { %v227_v56 = vsel %vm225_vm0, %v219_v48, 0.0 }
  0xcf   :  { %v196_v41 = vpop.permute.xlu1 %195  ;;  %v157_v42 = vpop.permute.xlu0 %156  ;;  %v228_v1 = vadd.f32 %v227_v56, %v226_v61 }
  0xd0   :  { %v220_v54 = vmul.f32 %v196_v41, %v178_v46  ;;  %v173_v57 = vadd.f32 %v157_v42, %v131_v51 }
  0xd2   :  { %v229_v62 = vsel %vm225_vm0, %v220_v54, 0.0  ;;  %v180_v2 = vmax.f32 %v173_v57, 0.0 }
  0xd3   :  { %v162_v49 = vpop.permute.xlu1 %161  ;;  %v119_v50 = vpop.permute.xlu0 %118  ;;  %v230_v6 = vadd.f32 %v229_v62, %v228_v1 }
  0xd4   :  { %v174_v58 = vadd.f32 %v162_v49, %v132_v53  ;;  %v133_v63 = vmul.f32 %v265_v32, %v119_v50 }
  0xd6   :  { %v181_v3 = vmax.f32 %v174_v58, 0.0 }
  0xd7   :  { %v167_v59 = vpop.permute.xlu1 %166  ;;  %v201_v60 = vpop.permute.xlu0 %200 }
  0xd8   :  { %v221_v0 = vmul.f32 %v201_v60, %v179_v55  ;;  %v175_v4 = vadd.f32 %v167_v59, %v133_v63 }
  0xda   :  { %v231_v5 = vsel %vm225_vm0, %v221_v0, 0.0  ;;  %v182_v12 = vmax.f32 %v175_v4, 0.0 }
  0xdb   :  { %v211_v7 = vpop.permute.xlu1 %210  ;;  %v206_v8 = vpop.permute.xlu0 %205  ;;  %v232_v11 = vadd.f32 %v231_v5, %v230_v6 }
  0xdc   :  { %v223_v9 = vmul.f32 %v211_v7, %v181_v3  ;;  %v222_v10 = vmul.f32 %v206_v8, %v180_v2 }
  0xde   :  { %v233_v13 = vsel %vm225_vm0, %v222_v10, 0.0  ;;  %v235_v16 = vsel %vm225_vm0, %v223_v9, 0.0 }
  0xdf   :  { %v234_v14 = vadd.f32 %v233_v13, %v232_v11  ;;  %v216_v15 = vpop.permute.xlu0 %215 }
  0xe0   :  { %v224_v17 = vmul.f32 %v216_v15, %v182_v12 }
  0xe1   :  { %v236_v18 = vadd.f32 %v235_v16, %v234_v14 }
  0xe2   :  { %v237_v19 = vsel %vm225_vm0, %v224_v17, 0.0 }
  0xe3   :  { %v238_v20 = vadd.f32 %v237_v19, %v236_v18 }
  0xe5   :  { %v239_v21 = vrot.slane %v238_v20, 4 }
  0xe7   :  { %v240_v22 = vadd.f32 %v239_v21, %v238_v20 }
  0xe9   :  { %v241_v23 = vrot.slane %v240_v22, 2 }
  0xeb   :  { %v242_v24 = vadd.f32 %v241_v23, %v240_v22 }
  0xed   :  { %v243_v25 = vrot.slane %v242_v24, 1 }
  0xef   :  { %v244_v27 = vadd.f32 %v243_v25, %v242_v24 }
  0xf1   :  { %v246_v28 = vadd.f32 %v245_v26, %v244_v27 }
  0xf3   :  { %248 = vst.msk [vmem:[#allocation9] sm:$0x1] %vm247_vm1, %v246_v28 }
  0xf4   :  { %352 = shalt.err (!%p349_p0)
}
  0xf5   :  { %s353_s12 = scalar_lea.hbm %s488_s5, 16 }
  0xf6   :  { %p354_p1 = scmp.ne.s32.totalorder %s488_s5, %s353_s12  ;;  %p357_p2 = scmp.lt.u32.totalorder %s353_s12, %s488_s5 }
  0xf8   :  { %p359_p3 = pnand %p357_p2, %p354_p1 }
  0xfa   :  { %362 = shalt.err (!%p359_p3)
}
  0xfb   :  { %258 = dma.vmem_to_hbm [thread:$0]  %s256_s7, 16, %s488_s5, [#allocation5]  }
  0xfc   :  { %367 = dma.done.wait [#allocation5], 16  }
  0xfd   :  { %368 = vsyncadd [#allocation5], 4294967280 }
  0xfe   :  { %262 = vsyncpa [#allocation4], 1 }
  0xff   :  { %263 = vsyncpa [#allocation7], 1 }
 0x100   :  { %264 = vsyncpa [#allocation5], 1 }

</bundles_post_ra>
